<compile_context>
chip_gen: v7x
topology: tpu7x:2x2x1
jax: 0.10.0
libtpu: 0.0.40
codegen_flags: <defaults>
</compile_context>

<pallas_src>
import functools

import jax
import jax.numpy as jnp
from jax import lax
from jax.experimental import pallas as pl
from jax.experimental.pallas import tpu as pltpu


def _round_up(n, m):
    return ((n + m - 1) // m) * m


def _pick_tile(n, target, align=8):
    """Largest multiple-of-`align` divisor of n that is <= target (else n)."""
    if n <= target:
        return n
    for cand in range(target - target % align, align - 1, -align):
        if n % cand == 0:
            return cand
    # TODO(synk): no aligned divisor <= target -> full-length tile; padding T and
    # masking would keep per-tile vreg pressure bounded for awkward T.
    return n


def _fourier_f_tile(nfreq):
    return 32 if nfreq >= 32 else _round_up(nfreq, 8)


@functools.lru_cache(maxsize=None)
def _vmem_limit_bytes():
    # Generation-aware budget: ~60% of physical VMEM (v5e/v6e 128 MiB, v7x 64 MiB).
    try:
        cap = int(pltpu.get_tpu_info().vmem_capacity_bytes)
    except Exception:
        cap = 64 * 1024 * 1024
    return max(32 * 1024 * 1024, min(int(cap * 0.6), 96 * 1024 * 1024))


# --------------------------------------------------------------------------
# In-kernel exact-form GELU (F.gelu default = erf form).
# erf via Abramowitz & Stegun 7.1.26 (|err| < 1.5e-7); exp/mul/add/where only.
# --------------------------------------------------------------------------

def _erf(x):
    a1, a2, a3, a4, a5 = (0.254829592, -0.284496736, 1.421413741,
                          -1.453152027, 1.061405429)
    p = 0.3275911
    ax = jnp.abs(x)
    t = 1.0 / (1.0 + p * ax)
    poly = ((((a5 * t + a4) * t + a3) * t + a2) * t + a1) * t
    y = 1.0 - poly * jnp.exp(-ax * ax)
    return jnp.where(x >= 0, y, -y)


def _gelu(x):
    # TODO(synk): review suggests bf16 gelu arithmetic on v6e/v7x; kept f32 math
    # (bf16 storage elsewhere) to preserve accuracy of the erf polynomial.
    return 0.5 * x * (1.0 + _erf(x * 0.7071067811865476))


# --------------------------------------------------------------------------
# input_fc (Linear) + post-Linear mask zeroing, tiled over rows, bf16 output
# --------------------------------------------------------------------------

def _linear_mask_kernel(x_ref, w_ref, b_ref, m_ref, o_ref):
    y = jnp.dot(x_ref[...].astype(jnp.bfloat16), w_ref[...],
                preferred_element_type=jnp.float32)
    o_ref[...] = ((y + b_ref[...]) * m_ref[...]).astype(o_ref.dtype)


def linear_masked(x2d, w_bf16, b, mask2d):
    n, din = x2d.shape
    hdim = w_bf16.shape[1]
    tn = min(512, _round_up(n, 16))
    n_pad = _round_up(n, tn)
    if n_pad != n:          # pad rows so awkward B*T never forces a huge tile
        x2d = jnp.pad(x2d, ((0, n_pad - n), (0, 0)))
        mask2d = jnp.pad(mask2d, ((0, n_pad - n), (0, 0)))
    out = pl.pallas_call(
        _linear_mask_kernel,
        out_shape=jax.ShapeDtypeStruct((n_pad, hdim), jnp.bfloat16),
        grid=(n_pad // tn,),
        in_specs=[pl.BlockSpec((tn, din), lambda i: (i, 0)),
                  pl.BlockSpec((din, hdim), lambda i: (0, 0)),
                  pl.BlockSpec((1, hdim), lambda i: (0, 0)),
                  pl.BlockSpec((tn, 1), lambda i: (i, 0))],
        out_specs=pl.BlockSpec((tn, hdim), lambda i: (i, 0)),
        compiler_params=pltpu.CompilerParams(
            dimension_semantics=("parallel",),
            vmem_limit_bytes=_vmem_limit_bytes()),
    )(x2d, w_bf16, b, mask2d)
    return out[:n] if n_pad != n else out


# --------------------------------------------------------------------------
# Fused ConvBlock: residual(+1x1 proj), GELU, conv1(dil d), GELU, conv2(dil d)
# Input/output activations bf16 (lane-dense, padded channels); f32 accumulation.
# --------------------------------------------------------------------------

def _convblock_kernel(x_ref, w1_ref, b1_ref, w2_ref, b2_ref, *rest,
                      d, t_len, tt, lpad, has_proj):
    if has_proj:
        wp_ref, bp_ref, o_ref, g_ref = rest
    else:
        o_ref, g_ref = rest
    t_idx = pl.program_id(1)

    # Refill the zero-padded gelu(h) halo scratch once per batch element.
    # TODO(synk): review suggests a bf16 scratch; kept f32 so the per-tap
    # unaligned dynamic-slice loads below stay on the proven 32-bit path.
    @pl.when(t_idx == 0)
    def _():
        g_ref[...] = jnp.zeros_like(g_ref)
        g_ref[pl.ds(lpad, t_len), :] = _gelu(x_ref[0].astype(jnp.float32))

    if tt == t_len:                     # single time tile -> fully static offsets
        t0 = 0
    else:
        t0 = pl.program_id(1) * tt
        if tt % 16 == 0:
            t0 = pl.multiple_of(t0, 16)
    ext = tt + 2 * d
    cout = w1_ref.shape[2]

    # conv1 over the extended window [t0-d, t0+tt+d); taps accumulate in f32.
    acc1 = jnp.zeros((ext, cout), jnp.float32)
    for j in range(3):
        xs = g_ref[pl.ds(lpad + t0 + (j - 2) * d, ext), :].astype(jnp.bfloat16)
        acc1 = acc1 + jnp.dot(xs, w1_ref[j], preferred_element_type=jnp.float32)
    z1 = acc1 + b1_ref[...]
    # Rows outside [0, T) must be exact zeros (conv2's temporal zero padding).
    rows = t0 - d + lax.broadcasted_iota(jnp.int32, (ext, 1), 0)
    z1 = jnp.where((rows >= 0) & (rows < t_len), z1, 0.0)
    g1 = _gelu(z1).astype(jnp.bfloat16)

    # conv2 over the output tile [t0, t0+tt).
    # TODO(synk): tap-folding into one K=3*Cin matmul (v6e/v7x MXU depth) not done.
    acc2 = jnp.zeros((tt, cout), jnp.float32)
    for j in range(3):
        acc2 = acc2 + jnp.dot(g1[j * d: j * d + tt, :], w2_ref[j],
                              preferred_element_type=jnp.float32)
    z2 = acc2 + b2_ref[...]

    # Residual path (optional 1x1 projector) fused as epilogue.
    h_res = x_ref[0, pl.ds(t0, tt), :]                     # bf16, 16-aligned start
    if has_proj:
        res = jnp.dot(h_res, wp_ref[...],
                      preferred_element_type=jnp.float32) + bp_ref[...]
    else:
        res = h_res.astype(jnp.float32)
    o_ref[0] = (z2 + res).astype(o_ref.dtype)


def fused_conv_block(h, blk, t_tile):
    bsz, t_len, cin = h.shape
    cout = int(blk['conv1_w'].shape[2])
    d = blk['dilation']
    has_proj = blk['proj_w'] is not None
    lpad = _round_up(2 * d, 8)
    scratch_rows = lpad + t_len + 2 * d
    nt = t_len // t_tile

    inputs = [h, blk['conv1_w'], blk['conv1_b'], blk['conv2_w'], blk['conv2_b']]
    # TODO(synk): full-T input block only changes with b; pl.Buffered(1) would
    # drop its second pipeline buffer on v7x (not used, kept default buffering).
    in_specs = [
        pl.BlockSpec((1, t_len, cin), lambda b, t: (b, 0, 0)),
        pl.BlockSpec((3, cin, cout), lambda b, t: (0, 0, 0)),
        pl.BlockSpec((1, cout), lambda b, t: (0, 0)),
        pl.BlockSpec((3, cout, cout), lambda b, t: (0, 0, 0)),
        pl.BlockSpec((1, cout), lambda b, t: (0, 0)),
    ]
    if has_proj:
        inputs += [blk['proj_w'], blk['proj_b']]
        in_specs += [pl.BlockSpec((cin, cout), lambda b, t: (0, 0)),
                     pl.BlockSpec((1, cout), lambda b, t: (0, 0))]

    kernel = functools.partial(_convblock_kernel, d=d, t_len=t_len, tt=t_tile,
                               lpad=lpad, has_proj=has_proj)
    return pl.pallas_call(
        kernel,
        out_shape=jax.ShapeDtypeStruct((bsz, t_len, cout), jnp.bfloat16),
        grid=(bsz, nt),
        in_specs=in_specs,
        out_specs=pl.BlockSpec((1, t_tile, cout), lambda b, t: (b, t, 0)),
        scratch_shapes=[pltpu.VMEM((scratch_rows, cin), jnp.float32)],
        compiler_params=pltpu.CompilerParams(
            dimension_semantics=("parallel", "arbitrary"),
            vmem_limit_bytes=_vmem_limit_bytes()),
    )(*inputs)


# --------------------------------------------------------------------------
# Trend: all causal convs (padding=k-1, crop last k-1) + mean, fused.
# No VMEM copy-scratch: the input is zero left-padded once in JAX; one aligned
# window load per tile, static tap slices, both grid axes parallel.
# --------------------------------------------------------------------------

def _trend_kernel(x_ref, *rest, ks, t_len, tt, lpad):
    nheads = len(ks)
    w_refs = rest[:nheads]
    bm_ref = rest[nheads]
    o_ref = rest[nheads + 1]

    if tt == t_len:
        t0 = 0
    else:
        t0 = pl.program_id(1) * tt
        if tt % 16 == 0:
            t0 = pl.multiple_of(t0, 16)

    comp = w_refs[0].shape[2]
    # Window covers logical rows [t0 - lpad, t0 + tt); left pad rows are zeros.
    win = x_ref[0, pl.ds(t0, lpad + tt), :]                 # bf16

    acc = jnp.zeros((tt, comp), jnp.float32)
    for hi, k in enumerate(ks):
        for j in range(k):
            off = lpad - (k - 1) + j                        # static slice offset
            acc = acc + jnp.dot(win[off: off + tt, :], w_refs[hi][j],
                                preferred_element_type=jnp.float32)
    o_ref[0] = acc * (1.0 / nheads) + bm_ref[...]


def trend_heads(h, ks, ws, bmean, t_tile):
    bsz, t_len, cin = h.shape
    comp = int(ws[0].shape[2])
    k_max = max(ks)
    lpad = _round_up(k_max - 1, 16)
    h_pad = jnp.pad(h, ((0, 0), (lpad, 0), (0, 0)))         # causal zero pad, bf16
    nt = t_len // t_tile

    in_specs = [pl.BlockSpec((1, lpad + t_len, cin), lambda b, t: (b, 0, 0))]
    in_specs += [pl.BlockSpec((int(w.shape[0]), cin, comp), lambda b, t: (0, 0, 0))
                 for w in ws]
    in_specs += [pl.BlockSpec((1, comp), lambda b, t: (0, 0))]

    kernel = functools.partial(_trend_kernel, ks=tuple(ks), t_len=t_len,
                               tt=t_tile, lpad=lpad)
    return pl.pallas_call(
        kernel,
        out_shape=jax.ShapeDtypeStruct((bsz, t_len, comp), jnp.float32),
        grid=(bsz, nt),
        in_specs=in_specs,
        out_specs=pl.BlockSpec((1, t_tile, comp), lambda b, t: (b, t, 0)),
        compiler_params=pltpu.CompilerParams(
            dimension_semantics=("parallel", "parallel"),
            vmem_limit_bytes=_vmem_limit_bytes()),
    )(h_pad, *ws, bmean)


# --------------------------------------------------------------------------
# Season: BandedFourierLayer (band 0, num_bands 1 -> all rfft frequencies).
# Plain 2-weight complex product (weight-stream bound -> no Karatsuba).
# --------------------------------------------------------------------------

def _fourier_kernel(xr_ref, xi_ref, wr_ref, wi_ref, br_ref, bi_ref,
                    or_ref, oi_ref):
    xr = xr_ref[...].astype(jnp.bfloat16)
    xi = xi_ref[...].astype(jnp.bfloat16)
    wr = wr_ref[...]
    wi = wi_ref[...]
    rr = jnp.einsum('fbi,fio->fbo', xr, wr, preferred_element_type=jnp.float32)
    ii = jnp.einsum('fbi,fio->fbo', xi, wi, preferred_element_type=jnp.float32)
    ri = jnp.einsum('fbi,fio->fbo', xr, wi, preferred_element_type=jnp.float32)
    ir = jnp.einsum('fbi,fio->fbo', xi, wr, preferred_element_type=jnp.float32)
    or_ref[...] = rr - ii + br_ref[...]
    oi_ref[...] = ri + ir + bi_ref[...]


def banded_fourier_layer(h, p):
    bsz, t_len, cin = h.shape
    nfreq = p['sfd_nfreq']
    f_tile = p['sfd_f_tile']
    f_pad = int(p['sfd_wr'].shape[0])
    comp = int(p['sfd_wr'].shape[2])

    # TODO(synk): rfft/irfft have no Pallas equivalent; kept as XLA ops.
    xf = jnp.fft.rfft(h.astype(jnp.float32), axis=1)         # (B, F, Cin) complex64
    # TODO(synk): review suggests keeping (B, F, C) layout; in-kernel batched
    # matmuls want leading batch dims on TPU, so the spectrum transpose stays in XLA.
    xr = jnp.transpose(xf.real, (1, 0, 2))                    # (F, B, Cin) f32
    xi = jnp.transpose(xf.imag, (1, 0, 2))
    if f_pad > nfreq:
        pad = ((0, f_pad - nfreq), (0, 0), (0, 0))
        xr = jnp.pad(xr, pad)
        xi = jnp.pad(xi, pad)

    spec_x = pl.BlockSpec((f_tile, bsz, cin), lambda f: (f, 0, 0))
    spec_w = pl.BlockSpec((f_tile, cin, comp), lambda f: (f, 0, 0))
    spec_b = pl.BlockSpec((f_tile, 1, comp), lambda f: (f, 0, 0))
    spec_o = pl.BlockSpec((f_tile, bsz, comp), lambda f: (f, 0, 0))
    o_r, o_i = pl.pallas_call(
        _fourier_kernel,
        out_shape=(jax.ShapeDtypeStruct((f_pad, bsz, comp), jnp.float32),
                   jax.ShapeDtypeStruct((f_pad, bsz, comp), jnp.float32)),
        grid=(f_pad // f_tile,),
        in_specs=[spec_x, spec_x, spec_w, spec_w, spec_b, spec_b],
        out_specs=(spec_o, spec_o),
        compiler_params=pltpu.CompilerParams(
            dimension_semantics=("parallel",),
            vmem_limit_bytes=_vmem_limit_bytes()),
    )(xr, xi, p['sfd_wr'], p['sfd_wi'], p['sfd_br'], p['sfd_bi'])

    out_fft = jnp.transpose(o_r[:nfreq] + 1j * o_i[:nfreq], (1, 0, 2))
    return jnp.fft.irfft(out_fft, n=t_len, axis=1)            # (B, T, comp_pad) f32


# --------------------------------------------------------------------------
# Parameter initialization (deterministic, synthetic; kernel-ready layouts).
# Real weights live in the leading slice; channel dims are zero-padded to
# multiples of 128 so every kernel output block is lane-dense.
# --------------------------------------------------------------------------

def init_params(key, input_dims, output_dims, hidden_dims, depth, kernels, length):
    keys = iter(jax.random.split(key, 256))

    def nrm(shape, scale=0.1):
        return scale * jax.random.normal(next(keys), shape, jnp.float32)

    def pad_axes(a, pads):
        cfg = [(0, 0)] * a.ndim
        for ax, new in pads:
            cfg[ax] = (0, new - a.shape[ax])
        return jnp.pad(a, cfg)

    comp = output_dims // 2
    hp = _round_up(hidden_dims, 128)
    op = _round_up(output_dims, 128)
    cp = _round_up(comp, 128)

    p = {'input_dims': input_dims, 'output_dims': output_dims,
         'component_dims': comp}

    # input_fc: Linear(input_dims -> hidden_dims); (Din, Hpad), bf16 for the MXU.
    p['fc_w'] = pad_axes(nrm((input_dims, hidden_dims)), [(1, hp)]).astype(jnp.bfloat16)
    p['fc_b'] = pad_axes(nrm((1, hidden_dims)), [(1, hp)])

    # DilatedConvEncoder(hidden, [hidden]*depth + [output], kernel_size=3).
    # Conv weights stored in (K, Cin_pad, Cout_pad) tap-matmul layout, bf16.
    channels = [hidden_dims] * depth + [output_dims]
    ch_pad = [hp] * depth + [op]
    blocks = []
    for i, out_ch in enumerate(channels):
        in_ch = channels[i - 1] if i > 0 else hidden_dims
        in_p = ch_pad[i - 1] if i > 0 else hp
        out_p = ch_pad[i]
        final = i == len(channels) - 1
        blk = {
            'dilation': 2 ** i,
            'conv1_w': pad_axes(nrm((3, in_ch, out_ch)),
                                [(1, in_p), (2, out_p)]).astype(jnp.bfloat16),
            'conv1_b': pad_axes(nrm((1, out_ch)), [(1, out_p)]),
            'conv2_w': pad_axes(nrm((3, out_ch, out_ch)),
                                [(1, out_p), (2, out_p)]).astype(jnp.bfloat16),
            'conv2_b': pad_axes(nrm((1, out_ch)), [(1, out_p)]),
        }
        if in_ch != out_ch or final:
            blk['proj_w'] = pad_axes(nrm((in_ch, out_ch)),
                                     [(0, in_p), (1, out_p)]).astype(jnp.bfloat16)
            blk['proj_b'] = pad_axes(nrm((1, out_ch)), [(1, out_p)])
        else:
            blk['proj_w'] = None
            blk['proj_b'] = None
        blocks.append(blk)
    p['blocks'] = blocks

    # tfd: Conv1d(output_dims, comp, k, padding=k-1), causal crop, mean over heads.
    p['tfd_ks'] = list(kernels)
    p['tfd_ws'] = [pad_axes(nrm((k, output_dims, comp)),
                            [(1, op), (2, cp)]).astype(jnp.bfloat16)
                   for k in kernels]
    tfd_bs = [nrm((comp,)) for _ in kernels]
    bmean = jnp.mean(jnp.stack(tfd_bs, 0), axis=0).reshape(1, comp)
    p['tfd_bmean'] = pad_axes(bmean, [(1, cp)])

    # sfd: BandedFourierLayer(output_dims, comp, band=0, num_bands=1, length).
    nfreq = length // 2 + 1
    f_tile = _fourier_f_tile(nfreq)
    f_pad = _round_up(nfreq, f_tile)
    p['sfd_wr'] = pad_axes(nrm((nfreq, output_dims, comp)),
                           [(0, f_pad), (1, op), (2, cp)]).astype(jnp.bfloat16)
    p['sfd_wi'] = pad_axes(nrm((nfreq, output_dims, comp)),
                           [(0, f_pad), (1, op), (2, cp)]).astype(jnp.bfloat16)
    p['sfd_br'] = pad_axes(nrm((nfreq, comp)).reshape(nfreq, 1, comp),
                           [(0, f_pad), (2, cp)])
    p['sfd_bi'] = pad_axes(nrm((nfreq, comp)).reshape(nfreq, 1, comp),
                           [(0, f_pad), (2, cp)])
    p['sfd_f_tile'] = f_tile
    p['sfd_nfreq'] = nfreq
    return p


# --------------------------------------------------------------------------
# CoSTEncoder forward
# --------------------------------------------------------------------------

def cost_encoder_forward(params, x, tcn_output=False, mask='all_true'):
    """x: (B, T, input_dims) f32. Returns (trend, season), both (B, T, Cout/2)."""
    bsz, t_len, din = x.shape

    # nan_mask = ~x.isnan().any(-1);  x[~nan_mask] = 0
    nan_mask = ~jnp.any(jnp.isnan(x), axis=-1)
    x = jnp.where(nan_mask[..., None], x, 0.0)

    if mask is None:
        mask = 'all_true'                           # eval-mode default
    if mask == 'all_true':
        m = jnp.ones((bsz, t_len), dtype=bool)
    elif mask == 'all_false':
        m = jnp.zeros((bsz, t_len), dtype=bool)
    elif mask == 'mask_last':
        m = jnp.ones((bsz, t_len), dtype=bool).at[:, -1].set(False)
    else:
        # TODO(synk): 'binomial'/'continuous' masks use host-side numpy RNG in the
        # reference; only deterministic mask modes are implemented here.
        raise NotImplementedError(mask)
    m = (m & nan_mask).astype(jnp.float32)

    # input_fc + post-Linear mask zeroing fused in one tiled Pallas kernel (bf16 out).
    h = linear_masked(x.reshape(bsz * t_len, din), params['fc_w'],
                      params['fc_b'], m.reshape(bsz * t_len, 1))
    h = h.reshape(bsz, t_len, -1)                   # (B, T, hidden_pad) bf16

    # feature_extractor (DilatedConvEncoder): one fused Pallas kernel per block.
    # Tile target is dilation-aware so halo overcompute stays bounded (2d/tt).
    for blk in params['blocks']:
        t_tile = _pick_tile(t_len, max(256, 8 * blk['dilation']), align=16)
        h = fused_conv_block(h, blk, t_tile)        # (B, T, cout_pad) bf16

    if tcn_output:
        return h[:, :, :params['output_dims']].astype(jnp.float32)

    # Trend: all causal convs + mean, one fused kernel (h read once).
    t_tile = _pick_tile(t_len, 256, align=16)
    trend = trend_heads(h, params['tfd_ks'], params['tfd_ws'],
                        params['tfd_bmean'], t_tile)

    # Season: BandedFourierLayer (rfft -> gridded complex matmul -> irfft).
    season = banded_fourier_layer(h, params)

    # repr_dropout(p=0.1) is identity in eval mode; slice real channels back out.
    comp = params['component_dims']
    return trend[:, :, :comp], season[:, :, :comp]


# --------------------------------------------------------------------------
# Main
# --------------------------------------------------------------------------

if __name__ == "__main__":
    B, T = 2, 16
    input_dims, output_dims, hidden_dims, depth = 4, 16, 32, 3
    kernels = [1, 2, 4]
    length = T                     # BandedFourierLayer length must match seq length

    key = jax.random.PRNGKey(0)
    kp, kx = jax.random.split(key)
    params = init_params(kp, input_dims, output_dims, hidden_dims, depth,
                         kernels, length)

    x = jax.random.normal(kx, (B, T, input_dims), jnp.float32)
    x = x.at[0, 3, 1].set(jnp.nan)     # exercise the NaN-masking path

    trend, season = cost_encoder_forward(params, x)
    trend, season = jax.block_until_ready((trend, season))

    comp = output_dims // 2
    assert trend.shape == (B, T, comp), trend.shape
    assert season.shape == (B, T, comp), season.shape
    assert bool(jnp.all(jnp.isfinite(trend))) and bool(jnp.all(jnp.isfinite(season)))
    print("KERNEL_OK")
</pallas_src>

<mosaic_0001>
module attributes {stable_mosaic.version = 11 : i64} {
  func.func @_linear_mask_kernel(%arg0: i32, %arg1: memref<32x4xf32, #tpu.memory_space<vmem>>, %arg2: memref<4x128xbf16, #tpu.memory_space<vmem>>, %arg3: memref<1x128xf32, #tpu.memory_space<vmem>>, %arg4: memref<32x1xf32, #tpu.memory_space<vmem>>, %arg5: memref<32x128xbf16, #tpu.memory_space<vmem>>) attributes {dimension_semantics = [#tpu.dimension_semantics<parallel>], iteration_bounds = array<i64: 1>, scalar_prefetch = 0 : i64, scratch_operands = 0 : i64, tpu.core_type = #tpu.core_type<tc>, window_params = [{transform_indices = @transform_0, window_bounds = array<i64: 32, 4>}, {pipeline_mode = #tpu.pipeline_mode<synchronous>, transform_indices = @transform_1, window_bounds = array<i64: 4, 128>}, {pipeline_mode = #tpu.pipeline_mode<synchronous>, transform_indices = @transform_2, window_bounds = array<i64: 1, 128>}, {transform_indices = @transform_3, window_bounds = array<i64: 32, 1>}, {transform_indices = @transform_4, window_bounds = array<i64: 32, 128>}]} {
    %c0 = arith.constant 0 : index
    %c0_0 = arith.constant 0 : index
    %0 = vector.load %arg1[%c0, %c0_0] : memref<32x4xf32, #tpu.memory_space<vmem>>, vector<32x4xf32>
    %1 = arith.truncf %0 : vector<32x4xf32> to vector<32x4xbf16>
    %c0_1 = arith.constant 0 : index
    %c0_2 = arith.constant 0 : index
    %2 = vector.load %arg2[%c0_1, %c0_2] : memref<4x128xbf16, #tpu.memory_space<vmem>>, vector<4x128xbf16>
    %cst = arith.constant dense<0.000000e+00> : vector<32x128xf32>
    %3 = tpu.matmul %1, %2, %cst {dimension_numbers = #tpu.dot_dimension_numbers<[1], [0], [0], [1], [0, 0, 1, 1], [], []>} : vector<32x4xbf16>, vector<4x128xbf16>, vector<32x128xf32> -> vector<32x128xf32>
    %c0_3 = arith.constant 0 : index
    %c0_4 = arith.constant 0 : index
    %4 = vector.load %arg3[%c0_3, %c0_4] : memref<1x128xf32, #tpu.memory_space<vmem>>, vector<1x128xf32>
    %5 = vector.broadcast %4 : vector<1x128xf32> to vector<32x128xf32>
    %6 = arith.addf %3, %5 : vector<32x128xf32>
    %c0_5 = arith.constant 0 : index
    %c0_6 = arith.constant 0 : index
    %7 = vector.load %arg4[%c0_5, %c0_6] : memref<32x1xf32, #tpu.memory_space<vmem>>, vector<32x1xf32>
    %8 = vector.broadcast %7 : vector<32x1xf32> to vector<32x128xf32>
    %9 = arith.mulf %6, %8 : vector<32x128xf32>
    %10 = arith.truncf %9 : vector<32x128xf32> to vector<32x128xbf16>
    %c0_7 = arith.constant 0 : index
    %c0_8 = arith.constant 0 : index
    %11 = vector.load %arg5[%c0_7, %c0_8] : memref<32x128xbf16, #tpu.memory_space<vmem>>, vector<32x128xbf16>
    tpu.vector_store %arg5[%c0_7, %c0_8], %10 {strides = array<i32>} : memref<32x128xbf16, #tpu.memory_space<vmem>>, vector<32x128xbf16>,
    return
  }
  func.func @transform_0(%arg0: i32) -> (i32, i32) {
    %c0_i32 = arith.constant 0 : i32
    %c0_i32_0 = arith.constant 0 : i32
    return %arg0, %c0_i32 : i32, i32
  }
  func.func @transform_1(%arg0: i32) -> (i32, i32) {
    %c0_i32 = arith.constant 0 : i32
    %c0_i32_0 = arith.constant 0 : i32
    %c0_i32_1 = arith.constant 0 : i32
    return %c0_i32, %c0_i32_0 : i32, i32
  }
  func.func @transform_2(%arg0: i32) -> (i32, i32) {
    %c0_i32 = arith.constant 0 : i32
    %c0_i32_0 = arith.constant 0 : i32
    %c0_i32_1 = arith.constant 0 : i32
    return %c0_i32, %c0_i32_0 : i32, i32
  }
  func.func @transform_3(%arg0: i32) -> (i32, i32) {
    %c0_i32 = arith.constant 0 : i32
    %c0_i32_0 = arith.constant 0 : i32
    return %arg0, %c0_i32 : i32, i32
  }
  func.func @transform_4(%arg0: i32) -> (i32, i32) {
    %c0_i32 = arith.constant 0 : i32
    %c0_i32_0 = arith.constant 0 : i32
    return %arg0, %c0_i32 : i32, i32
  }
}

</mosaic_0001>

<bundles_post_ra>
// kernel: tpu_custom_call.1
= control target key start
LH: loop header
LB: loop body
LE: loop exit
PB: predicated region body
PF: predicated region fallthrough
CT: control target
= control target key end

     0   :  { %vm40_vm0 = vcmask 1041408   ;;  %vm33_vm1 = vcmask 31744   ;;  %v219_v9 = vmov 0   ;;  %s292_s0 = inlined_call_operand.vmem [shape: f32[32,4], index: 0, kind: input, shape index: {}]   ;;  %s293_s1 = inlined_call_operand.vmem [shape: bf16[4,128], index: 1, kind: input, shape index: {}]   ;;  %s294_s2 = inlined_call_operand.vmem [shape: f32[1,128], index: 2, kind: input, shape index: {}]   ;;  %s295_s3 = inlined_call_operand.vmem [shape: f32[32,1], index: 3, kind: input, shape index: {}]   ;;  %s296_s4 = inlined_call_operand.hbm [shape: bf16[32,128], index: 4, kind: output, shape index: {}]  }
   0x1   :  { %v25_v0 = vld [vmem:[%s293_s1] sm:$0x3]  ;;  %v20_v2 = vld [vmem:[%s292_s0 + $0x8] sm:$0xff]  ;;  %v21_v5 = vld [vmem:[%s292_s0 + $0x10] sm:$0xff]  ;;  %194 = vset.pattern.permute.xlu1 %v219_v9  ;;  %193 = vset.pattern.permute.xlu0 %v219_v9 }
   0x2   :  { %v19_v1 = vld [vmem:[%s292_s0] sm:$0xff]  ;;  %188 = vmatprep.subr.msk.bf16.mxu0 %vm40_vm0, %v25_v0  ;;  %v42_v3 = vsel %vm40_vm0, %v25_v0, 0  ;;  %v22_v6 = vld [vmem:[%s292_s0 + $0x18] sm:$0xff]  ;;  %v95_v7 = vld [vmem:[%s295_s3 + $0x10] sm:$0xff] }
   0x3   :  { %v23_v4 = vpack.c.bf16 %v20_v2, %v19_v1  ;;  %183 = vmatpush3.bf16.msra.mxu0 %v42_v3  ;;  %v24_v8 = vpack.c.bf16 %v22_v6, %v21_v5  ;;  %v93_v10 = vld [vmem:[%s295_s3] sm:$0xff] }
   0x5   :  { %184 = vmatprep.mubr.msk.bf16.mxu0 %vm33_vm1, %v23_v4 }
   0x6   :  { %9 = vsyncpa [#allocation3], 0  ;;  %109 = vperm.xlu1 %194, %v95_v7   ;;  %99 = vperm.xlu0 %193, %v93_v10   ;;  %v96_v11 = vld [vmem:[%s295_s3 + $0x18] sm:$0xff]  ;;  %v94_v12 = vld [vmem:[%s295_s3 + $0x8] sm:$0xff]  ;;  %s220_s7 = smov [#allocation2]  }
   0x7   :  { %185 = vmatmul.mubr.msk.bf16.vlgmr.msra.gmra.mrb[0].mxu0 %vm33_vm1, %v24_v8  ;;  %v157_v14 = vld [vmem:[%s294_s2] ss:$0 sm:$0xff]  ;;  %s146_s8 = sshll.u32 %s220_s7, 4  ;;  %s147_s8 = int_to_ptr.vmem [resolvable:$true] %s146_s8 }
   0x8   :  { %s195_s2 = scalar_lea.vmem %s147_s8, 256  ;;  %p200_p1 = scmp.lt.s32.totalorder %s147_s8, %s147_s8 }
   0x9   :  { %p196_p0 = scmp.ne.s32.totalorder %s147_s8, %s195_s2  ;;  %p201_p2 = scmp.lt.s32.totalorder %s195_s2, %s195_s2 }
   0xa   :  { %114 = vperm.xlu1 %194, %v96_v11   ;;  %104 = vperm.xlu0 %193, %v94_v12  }
   0xb   :  { %p202_p3 = por %p201_p2, %p200_p1 }
   0xd   :  { %p203_p4 = pnand %p202_p3, %p196_p0 }
  0x85   :  { %v110_v13 = vpop.permute.xlu1 %109  ;;  %v100_v15 = vpop.permute.xlu0 %99 }
  0x89   :  { %v115_v23 = vpop.permute.xlu1 %114  ;;  %v105_v26 = vpop.permute.xlu0 %104 }
  0xda   :  { %v186_v16 = vpop.f32.mrb[0].mxu0 }
  0xdb   :  { %v87_v17 = vadd.f32 %v186_v16, %v157_v14  ;;  %v78_v18 = vpop.f32.mrb[1].mxu0 }
  0xdc   :  { %v79_v19 = vadd.f32 %v157_v14, %v78_v18  ;;  %v187_v20 = vpop.f32.mrb[2].mxu0 }
  0xdd   :  { %v90_v21 = vadd.f32 %v187_v20, %v157_v14  ;;  %v81_v22 = vpop.f32.mrb[3].mxu0  ;;  %v119_v25 = vmul.f32 %v110_v13, %v87_v17 }
  0xde   :  { %v82_v24 = vadd.f32 %v157_v14, %v81_v22  ;;  %v117_v28 = vmul.f32 %v100_v15, %v79_v19 }
  0xdf   :  { %v120_v27 = vmul.f32 %v115_v23, %v90_v21 }
  0xe0   :  { %v118_v29 = vmul.f32 %v105_v26, %v82_v24 }
  0xe1   :  { %v176_v30 = vpack.c.bf16 %v120_v27, %v119_v25 }
  0xe2   :  { %v171_v31 = vpack.c.bf16 %v118_v29, %v117_v28 }
  0xe3   :  { %178 = vst [vmem:[#allocation2 + $0x8] sm:$0xff] %v176_v30  }
  0xe4   :  { %172 = vst [vmem:[#allocation2] sm:$0xff] %v171_v31  }
  0xe5   :  { %206 = shalt.err (!%p203_p4)
}
  0xe6   :  { %s207_s10 = scalar_lea.hbm %s296_s4, 256 }
  0xe7   :  { %p208_p5 = scmp.ne.s32.totalorder %s296_s4, %s207_s10  ;;  %p211_p6 = scmp.lt.u32.totalorder %s207_s10, %s296_s4 }
  0xe9   :  { %p213_p7 = pnand %p211_p6, %p208_p5 }
  0xeb   :  { %216 = shalt.err (!%p213_p7)
}
  0xec   :  { %s221_s15 = smov 64   ;;  %s222_s16 = smov 4  }
  0xed   :  { %152 = dma.vmem_to_hbm [thread:$0]  %s147_s8, 256, %s296_s4, [#allocation3], %s221_s15, %s221_s15, %s222_s16  }
  0xee   :  { %217 = dma.done.wait [#allocation3], 256  }
  0xef   :  { %218 = vsyncadd [#allocation3], 4294967040 }
  0xf0   :  { %156 = vsyncpa [#allocation3], 1 }

</bundles_post_ra>
